<compile_context>
chip_gen: v7x
topology: tpu7x:2x2x1
jax: 0.10.0
libtpu: 0.0.40
codegen_flags: <defaults>
</compile_context>

<pallas_src>
import jax
import jax.numpy as jnp
from jax.experimental import pallas as pl
from jax.experimental.pallas import tpu as pltpu


def _make_residual_kernel(C):
    """Kernel for one (C, Rt, 128) slab:  o[c] = sum_cp w[cp,c]*x[cp] + b[c] + x[c]."""

    def residual_kernel(w_ref, b_ref, x_ref, o_ref):
        # w_ref: (C, C) f32 in SMEM (scalars), b_ref: (C,) f32 in SMEM.
        # x_ref / o_ref: (C, Rt, 128) VMEM blocks (batch dim squeezed).
        x = x_ref[...].astype(jnp.float32)            # (C, Rt, 128)
        for c in range(C):                            # static unroll: C is small
            acc = x[c] + b_ref[c]                     # residual + bias, dense slab
            for cp in range(C):                       # C VPU scalar*vector FMAs
                acc = acc + w_ref[cp, c] * x[cp]
            o_ref[c] = acc.astype(o_ref.dtype)        # dense (Rt, 128) store

    return residual_kernel


def _pick_row_tile(rows, max_rows):
    """Largest row tile: full extent if it fits, else a multiple-of-8 divisor."""
    if rows <= max_rows:
        return rows
    t = (max_rows // 8) * 8
    while t >= 8:
        if rows % t == 0:
            return t
        t -= 8
    return rows  # fall back to the full (untiled) axis


def residual_forward(x_nchw, w, b, *, max_rows=2048):
    """x_nchw: (B, C, H, W).  w: (C_in, C_out) = (C, C).  b: (C,)."""
    B, C, H, W = x_nchw.shape
    HW = H * W
    HW_pad = ((HW + 127) // 128) * 128          # pad flat spatial axis to lane multiple
    x_flat = x_nchw.reshape(B, C, HW)           # free reshape, stays NCHW-contiguous
    if HW_pad != HW:
        x_flat = jnp.pad(x_flat, ((0, 0), (0, 0), (0, HW_pad - HW)))
    R = HW_pad // 128
    x4d = x_flat.reshape(B, C, R, 128)          # sublane-dense: (rows, lanes)

    Rt = _pick_row_tile(R, max_rows)
    # Keep >= 2 parallel grid steps so v7x's two TensorCores both get work.
    if B == 1 and R // Rt == 1 and R % 16 == 0:
        Rt = R // 2
    grid = (B, R // Rt)

    itemsize = jnp.dtype(x_nchw.dtype).itemsize
    cost = pl.CostEstimate(
        flops=2 * C * C * B * HW,
        transcendentals=0,
        bytes_accessed=2 * B * C * HW * itemsize + (C * C + C) * 4,
    )

    out4d = pl.pallas_call(
        _make_residual_kernel(C),
        out_shape=jax.ShapeDtypeStruct((B, C, R, 128), x_nchw.dtype),
        grid=grid,
        in_specs=[
            pl.BlockSpec(memory_space=pltpu.MemorySpace.SMEM),   # w (C, C) scalars
            pl.BlockSpec(memory_space=pltpu.MemorySpace.SMEM),   # b (C,) scalars
            pl.BlockSpec((pl.Squeezed(), C, Rt, 128),
                         lambda bi, ti: (bi, 0, ti, 0)),
        ],
        out_specs=pl.BlockSpec((pl.Squeezed(), C, Rt, 128),
                               lambda bi, ti: (bi, 0, ti, 0)),
        compiler_params=pltpu.CompilerParams(
            dimension_semantics=("parallel", "parallel"),
            vmem_limit_bytes=32 * 1024 * 1024,   # safe bound even on v7x (64 MiB phys)
        ),
        cost_estimate=cost,
    )(w, b, x4d)

    out_flat = out4d.reshape(B, C, HW_pad)
    if HW_pad != HW:
        out_flat = out_flat[:, :, :HW]
    return out_flat.reshape(B, C, H, W)


if __name__ == "__main__":
    key = jax.random.PRNGKey(0)
    kx, kw, kb = jax.random.split(key, 3)

    B, C, H, W = 2, 4, 16, 16
    x = jax.random.normal(kx, (B, C, H, W), dtype=jnp.float32)

    # Deterministic parameters for the wrapped fn (1x1 conv weight / bias),
    # stored as (C_in, C_out); a PyTorch Conv2d weight (C_out, C_in, 1, 1)
    # must be squeezed + transposed by the caller to match.
    w = jax.random.normal(kw, (C, C), dtype=jnp.float32) * 0.1
    b = jax.random.normal(kb, (C,), dtype=jnp.float32) * 0.1

    out = residual_forward(x, w, b)
    out = jax.block_until_ready(out)

    # Pure-JAX reference:  fn(x) + x  with fn = 1x1 conv over channels.
    fx = jnp.einsum("bchw,cd->bdhw", x, w,
                    precision=jax.lax.Precision.HIGHEST) + b[None, :, None, None]
    ref = fx + x

    assert out.shape == (B, C, H, W)
    assert jnp.allclose(out, ref, atol=1e-5, rtol=1e-5)
    print("KERNEL_OK")
</pallas_src>

<mosaic_0001>
module attributes {stable_mosaic.version = 11 : i64} {
  func.func @residual_kernel(%arg0: i32, %arg1: i32, %arg2: memref<4x4xf32, #tpu.memory_space<smem>>, %arg3: memref<4xf32, #tpu.memory_space<smem>>, %arg4: memref<1x4x2x128xf32, #tpu.memory_space<vmem>>, %arg5: memref<1x4x2x128xf32, #tpu.memory_space<vmem>>) attributes {dimension_semantics = [#tpu.dimension_semantics<parallel>, #tpu.dimension_semantics<parallel>], iteration_bounds = array<i64: 2, 1>, scalar_prefetch = 0 : i64, scratch_operands = 0 : i64, tpu.core_type = #tpu.core_type<tc>, window_params = [{transform_indices = @transform_0, window_bounds = array<i64: 4, 4>}, {transform_indices = @transform_1, window_bounds = array<i64: 4>}, {transform_indices = @transform_2, window_bounds = array<i64: 1, 4, 2, 128>}, {transform_indices = @transform_3, window_bounds = array<i64: 1, 4, 2, 128>}]} {
    %c0 = arith.constant 0 : index
    %c0_0 = arith.constant 0 : index
    %c0_1 = arith.constant 0 : index
    %c0_2 = arith.constant 0 : index
    %0 = vector.load %arg4[%c0, %c0_0, %c0_1, %c0_2] : memref<1x4x2x128xf32, #tpu.memory_space<vmem>>, vector<1x4x2x128xf32>
    %1 = vector.shape_cast %0 : vector<1x4x2x128xf32> to vector<4x2x128xf32>
    %2 = vector.extract_strided_slice %1 {offsets = [0, 0, 0], sizes = [1, 2, 128], strides = [1, 1, 1]} : vector<4x2x128xf32> to vector<1x2x128xf32>
    %3 = vector.shape_cast %2 : vector<1x2x128xf32> to vector<2x128xf32>
    %c0_3 = arith.constant 0 : index
    %4 = memref.load %arg3[%c0_3] : memref<4xf32, #tpu.memory_space<smem>>
    %5 = vector.broadcast %4 : f32 to vector<2x128xf32>
    %6 = arith.addf %3, %5 : vector<2x128xf32>
    %c0_4 = arith.constant 0 : index
    %c0_5 = arith.constant 0 : index
    %7 = memref.load %arg2[%c0_4, %c0_5] : memref<4x4xf32, #tpu.memory_space<smem>>
    %8 = vector.extract_strided_slice %1 {offsets = [0, 0, 0], sizes = [1, 2, 128], strides = [1, 1, 1]} : vector<4x2x128xf32> to vector<1x2x128xf32>
    %9 = vector.shape_cast %8 : vector<1x2x128xf32> to vector<2x128xf32>
    %10 = vector.broadcast %7 : f32 to vector<2x128xf32>
    %11 = arith.mulf %10, %9 : vector<2x128xf32>
    %12 = arith.addf %6, %11 : vector<2x128xf32>
    %c1 = arith.constant 1 : index
    %c0_6 = arith.constant 0 : index
    %13 = memref.load %arg2[%c1, %c0_6] : memref<4x4xf32, #tpu.memory_space<smem>>
    %14 = vector.extract_strided_slice %1 {offsets = [1, 0, 0], sizes = [1, 2, 128], strides = [1, 1, 1]} : vector<4x2x128xf32> to vector<1x2x128xf32>
    %15 = vector.shape_cast %14 : vector<1x2x128xf32> to vector<2x128xf32>
    %16 = vector.broadcast %13 : f32 to vector<2x128xf32>
    %17 = arith.mulf %16, %15 : vector<2x128xf32>
    %18 = arith.addf %12, %17 : vector<2x128xf32>
    %c2 = arith.constant 2 : index
    %c0_7 = arith.constant 0 : index
    %19 = memref.load %arg2[%c2, %c0_7] : memref<4x4xf32, #tpu.memory_space<smem>>
    %20 = vector.extract_strided_slice %1 {offsets = [2, 0, 0], sizes = [1, 2, 128], strides = [1, 1, 1]} : vector<4x2x128xf32> to vector<1x2x128xf32>
    %21 = vector.shape_cast %20 : vector<1x2x128xf32> to vector<2x128xf32>
    %22 = vector.broadcast %19 : f32 to vector<2x128xf32>
    %23 = arith.mulf %22, %21 : vector<2x128xf32>
    %24 = arith.addf %18, %23 : vector<2x128xf32>
    %c3 = arith.constant 3 : index
    %c0_8 = arith.constant 0 : index
    %25 = memref.load %arg2[%c3, %c0_8] : memref<4x4xf32, #tpu.memory_space<smem>>
    %26 = vector.extract_strided_slice %1 {offsets = [3, 0, 0], sizes = [1, 2, 128], strides = [1, 1, 1]} : vector<4x2x128xf32> to vector<1x2x128xf32>
    %27 = vector.shape_cast %26 : vector<1x2x128xf32> to vector<2x128xf32>
    %28 = vector.broadcast %25 : f32 to vector<2x128xf32>
    %29 = arith.mulf %28, %27 : vector<2x128xf32>
    %30 = arith.addf %24, %29 : vector<2x128xf32>
    %c0_9 = arith.constant 0 : index
    %c0_10 = arith.constant 0 : index
    %c0_11 = arith.constant 0 : index
    %c0_12 = arith.constant 0 : index
    %31 = vector.load %arg5[%c0_9, %c0_10, %c0_11, %c0_12] : memref<1x4x2x128xf32, #tpu.memory_space<vmem>>, vector<1x1x2x128xf32>
    %32 = vector.shape_cast %31 : vector<1x1x2x128xf32> to vector<2x128xf32>
    %33 = vector.shape_cast %30 : vector<2x128xf32> to vector<1x1x2x128xf32>
    tpu.vector_store %arg5[%c0_9, %c0_10, %c0_11, %c0_12], %33 {strides = array<i32>} : memref<1x4x2x128xf32, #tpu.memory_space<vmem>>, vector<1x1x2x128xf32>,
    %34 = vector.extract_strided_slice %1 {offsets = [1, 0, 0], sizes = [1, 2, 128], strides = [1, 1, 1]} : vector<4x2x128xf32> to vector<1x2x128xf32>
    %35 = vector.shape_cast %34 : vector<1x2x128xf32> to vector<2x128xf32>
    %c1_13 = arith.constant 1 : index
    %36 = memref.load %arg3[%c1_13] : memref<4xf32, #tpu.memory_space<smem>>
    %37 = vector.broadcast %36 : f32 to vector<2x128xf32>
    %38 = arith.addf %35, %37 : vector<2x128xf32>
    %c0_14 = arith.constant 0 : index
    %c1_15 = arith.constant 1 : index
    %39 = memref.load %arg2[%c0_14, %c1_15] : memref<4x4xf32, #tpu.memory_space<smem>>
    %40 = vector.extract_strided_slice %1 {offsets = [0, 0, 0], sizes = [1, 2, 128], strides = [1, 1, 1]} : vector<4x2x128xf32> to vector<1x2x128xf32>
    %41 = vector.shape_cast %40 : vector<1x2x128xf32> to vector<2x128xf32>
    %42 = vector.broadcast %39 : f32 to vector<2x128xf32>
    %43 = arith.mulf %42, %41 : vector<2x128xf32>
    %44 = arith.addf %38, %43 : vector<2x128xf32>
    %c1_16 = arith.constant 1 : index
    %c1_17 = arith.constant 1 : index
    %45 = memref.load %arg2[%c1_16, %c1_17] : memref<4x4xf32, #tpu.memory_space<smem>>
    %46 = vector.extract_strided_slice %1 {offsets = [1, 0, 0], sizes = [1, 2, 128], strides = [1, 1, 1]} : vector<4x2x128xf32> to vector<1x2x128xf32>
    %47 = vector.shape_cast %46 : vector<1x2x128xf32> to vector<2x128xf32>
    %48 = vector.broadcast %45 : f32 to vector<2x128xf32>
    %49 = arith.mulf %48, %47 : vector<2x128xf32>
    %50 = arith.addf %44, %49 : vector<2x128xf32>
    %c2_18 = arith.constant 2 : index
    %c1_19 = arith.constant 1 : index
    %51 = memref.load %arg2[%c2_18, %c1_19] : memref<4x4xf32, #tpu.memory_space<smem>>
    %52 = vector.extract_strided_slice %1 {offsets = [2, 0, 0], sizes = [1, 2, 128], strides = [1, 1, 1]} : vector<4x2x128xf32> to vector<1x2x128xf32>
    %53 = vector.shape_cast %52 : vector<1x2x128xf32> to vector<2x128xf32>
    %54 = vector.broadcast %51 : f32 to vector<2x128xf32>
    %55 = arith.mulf %54, %53 : vector<2x128xf32>
    %56 = arith.addf %50, %55 : vector<2x128xf32>
    %c3_20 = arith.constant 3 : index
    %c1_21 = arith.constant 1 : index
    %57 = memref.load %arg2[%c3_20, %c1_21] : memref<4x4xf32, #tpu.memory_space<smem>>
    %58 = vector.extract_strided_slice %1 {offsets = [3, 0, 0], sizes = [1, 2, 128], strides = [1, 1, 1]} : vector<4x2x128xf32> to vector<1x2x128xf32>
    %59 = vector.shape_cast %58 : vector<1x2x128xf32> to vector<2x128xf32>
    %60 = vector.broadcast %57 : f32 to vector<2x128xf32>
    %61 = arith.mulf %60, %59 : vector<2x128xf32>
    %62 = arith.addf %56, %61 : vector<2x128xf32>
    %c0_22 = arith.constant 0 : index
    %c1_23 = arith.constant 1 : index
    %c0_24 = arith.constant 0 : index
    %c0_25 = arith.constant 0 : index
    %63 = vector.load %arg5[%c0_22, %c1_23, %c0_24, %c0_25] : memref<1x4x2x128xf32, #tpu.memory_space<vmem>>, vector<1x1x2x128xf32>
    %64 = vector.shape_cast %63 : vector<1x1x2x128xf32> to vector<2x128xf32>
    %65 = vector.shape_cast %62 : vector<2x128xf32> to vector<1x1x2x128xf32>
    tpu.vector_store %arg5[%c0_22, %c1_23, %c0_24, %c0_25], %65 {strides = array<i32>} : memref<1x4x2x128xf32, #tpu.memory_space<vmem>>, vector<1x1x2x128xf32>,
    %66 = vector.extract_strided_slice %1 {offsets = [2, 0, 0], sizes = [1, 2, 128], strides = [1, 1, 1]} : vector<4x2x128xf32> to vector<1x2x128xf32>
    %67 = vector.shape_cast %66 : vector<1x2x128xf32> to vector<2x128xf32>
    %c2_26 = arith.constant 2 : index
    %68 = memref.load %arg3[%c2_26] : memref<4xf32, #tpu.memory_space<smem>>
    %69 = vector.broadcast %68 : f32 to vector<2x128xf32>
    %70 = arith.addf %67, %69 : vector<2x128xf32>
    %c0_27 = arith.constant 0 : index
    %c2_28 = arith.constant 2 : index
    %71 = memref.load %arg2[%c0_27, %c2_28] : memref<4x4xf32, #tpu.memory_space<smem>>
    %72 = vector.extract_strided_slice %1 {offsets = [0, 0, 0], sizes = [1, 2, 128], strides = [1, 1, 1]} : vector<4x2x128xf32> to vector<1x2x128xf32>
    %73 = vector.shape_cast %72 : vector<1x2x128xf32> to vector<2x128xf32>
    %74 = vector.broadcast %71 : f32 to vector<2x128xf32>
    %75 = arith.mulf %74, %73 : vector<2x128xf32>
    %76 = arith.addf %70, %75 : vector<2x128xf32>
    %c1_29 = arith.constant 1 : index
    %c2_30 = arith.constant 2 : index
    %77 = memref.load %arg2[%c1_29, %c2_30] : memref<4x4xf32, #tpu.memory_space<smem>>
    %78 = vector.extract_strided_slice %1 {offsets = [1, 0, 0], sizes = [1, 2, 128], strides = [1, 1, 1]} : vector<4x2x128xf32> to vector<1x2x128xf32>
    %79 = vector.shape_cast %78 : vector<1x2x128xf32> to vector<2x128xf32>
    %80 = vector.broadcast %77 : f32 to vector<2x128xf32>
    %81 = arith.mulf %80, %79 : vector<2x128xf32>
    %82 = arith.addf %76, %81 : vector<2x128xf32>
    %c2_31 = arith.constant 2 : index
    %c2_32 = arith.constant 2 : index
    %83 = memref.load %arg2[%c2_31, %c2_32] : memref<4x4xf32, #tpu.memory_space<smem>>
    %84 = vector.extract_strided_slice %1 {offsets = [2, 0, 0], sizes = [1, 2, 128], strides = [1, 1, 1]} : vector<4x2x128xf32> to vector<1x2x128xf32>
    %85 = vector.shape_cast %84 : vector<1x2x128xf32> to vector<2x128xf32>
    %86 = vector.broadcast %83 : f32 to vector<2x128xf32>
    %87 = arith.mulf %86, %85 : vector<2x128xf32>
    %88 = arith.addf %82, %87 : vector<2x128xf32>
    %c3_33 = arith.constant 3 : index
    %c2_34 = arith.constant 2 : index
    %89 = memref.load %arg2[%c3_33, %c2_34] : memref<4x4xf32, #tpu.memory_space<smem>>
    %90 = vector.extract_strided_slice %1 {offsets = [3, 0, 0], sizes = [1, 2, 128], strides = [1, 1, 1]} : vector<4x2x128xf32> to vector<1x2x128xf32>
    %91 = vector.shape_cast %90 : vector<1x2x128xf32> to vector<2x128xf32>
    %92 = vector.broadcast %89 : f32 to vector<2x128xf32>
    %93 = arith.mulf %92, %91 : vector<2x128xf32>
    %94 = arith.addf %88, %93 : vector<2x128xf32>
    %c0_35 = arith.constant 0 : index
    %c2_36 = arith.constant 2 : index
    %c0_37 = arith.constant 0 : index
    %c0_38 = arith.constant 0 : index
    %95 = vector.load %arg5[%c0_35, %c2_36, %c0_37, %c0_38] : memref<1x4x2x128xf32, #tpu.memory_space<vmem>>, vector<1x1x2x128xf32>
    %96 = vector.shape_cast %95 : vector<1x1x2x128xf32> to vector<2x128xf32>
    %97 = vector.shape_cast %94 : vector<2x128xf32> to vector<1x1x2x128xf32>
    tpu.vector_store %arg5[%c0_35, %c2_36, %c0_37, %c0_38], %97 {strides = array<i32>} : memref<1x4x2x128xf32, #tpu.memory_space<vmem>>, vector<1x1x2x128xf32>,
    %98 = vector.extract_strided_slice %1 {offsets = [3, 0, 0], sizes = [1, 2, 128], strides = [1, 1, 1]} : vector<4x2x128xf32> to vector<1x2x128xf32>
    %99 = vector.shape_cast %98 : vector<1x2x128xf32> to vector<2x128xf32>
    %c3_39 = arith.constant 3 : index
    %100 = memref.load %arg3[%c3_39] : memref<4xf32, #tpu.memory_space<smem>>
    %101 = vector.broadcast %100 : f32 to vector<2x128xf32>
    %102 = arith.addf %99, %101 : vector<2x128xf32>
    %c0_40 = arith.constant 0 : index
    %c3_41 = arith.constant 3 : index
    %103 = memref.load %arg2[%c0_40, %c3_41] : memref<4x4xf32, #tpu.memory_space<smem>>
    %104 = vector.extract_strided_slice %1 {offsets = [0, 0, 0], sizes = [1, 2, 128], strides = [1, 1, 1]} : vector<4x2x128xf32> to vector<1x2x128xf32>
    %105 = vector.shape_cast %104 : vector<1x2x128xf32> to vector<2x128xf32>
    %106 = vector.broadcast %103 : f32 to vector<2x128xf32>
    %107 = arith.mulf %106, %105 : vector<2x128xf32>
    %108 = arith.addf %102, %107 : vector<2x128xf32>
    %c1_42 = arith.constant 1 : index
    %c3_43 = arith.constant 3 : index
    %109 = memref.load %arg2[%c1_42, %c3_43] : memref<4x4xf32, #tpu.memory_space<smem>>
    %110 = vector.extract_strided_slice %1 {offsets = [1, 0, 0], sizes = [1, 2, 128], strides = [1, 1, 1]} : vector<4x2x128xf32> to vector<1x2x128xf32>
    %111 = vector.shape_cast %110 : vector<1x2x128xf32> to vector<2x128xf32>
    %112 = vector.broadcast %109 : f32 to vector<2x128xf32>
    %113 = arith.mulf %112, %111 : vector<2x128xf32>
    %114 = arith.addf %108, %113 : vector<2x128xf32>
    %c2_44 = arith.constant 2 : index
    %c3_45 = arith.constant 3 : index
    %115 = memref.load %arg2[%c2_44, %c3_45] : memref<4x4xf32, #tpu.memory_space<smem>>
    %116 = vector.extract_strided_slice %1 {offsets = [2, 0, 0], sizes = [1, 2, 128], strides = [1, 1, 1]} : vector<4x2x128xf32> to vector<1x2x128xf32>
    %117 = vector.shape_cast %116 : vector<1x2x128xf32> to vector<2x128xf32>
    %118 = vector.broadcast %115 : f32 to vector<2x128xf32>
    %119 = arith.mulf %118, %117 : vector<2x128xf32>
    %120 = arith.addf %114, %119 : vector<2x128xf32>
    %c3_46 = arith.constant 3 : index
    %c3_47 = arith.constant 3 : index
    %121 = memref.load %arg2[%c3_46, %c3_47] : memref<4x4xf32, #tpu.memory_space<smem>>
    %122 = vector.extract_strided_slice %1 {offsets = [3, 0, 0], sizes = [1, 2, 128], strides = [1, 1, 1]} : vector<4x2x128xf32> to vector<1x2x128xf32>
    %123 = vector.shape_cast %122 : vector<1x2x128xf32> to vector<2x128xf32>
    %124 = vector.broadcast %121 : f32 to vector<2x128xf32>
    %125 = arith.mulf %124, %123 : vector<2x128xf32>
    %126 = arith.addf %120, %125 : vector<2x128xf32>
    %c0_48 = arith.constant 0 : index
    %c3_49 = arith.constant 3 : index
    %c0_50 = arith.constant 0 : index
    %c0_51 = arith.constant 0 : index
    %127 = vector.load %arg5[%c0_48, %c3_49, %c0_50, %c0_51] : memref<1x4x2x128xf32, #tpu.memory_space<vmem>>, vector<1x1x2x128xf32>
    %128 = vector.shape_cast %127 : vector<1x1x2x128xf32> to vector<2x128xf32>
    %129 = vector.shape_cast %126 : vector<2x128xf32> to vector<1x1x2x128xf32>
    tpu.vector_store %arg5[%c0_48, %c3_49, %c0_50, %c0_51], %129 {strides = array<i32>} : memref<1x4x2x128xf32, #tpu.memory_space<vmem>>, vector<1x1x2x128xf32>,
    return
  }
  func.func @transform_0(%arg0: i32, %arg1: i32) -> (i32, i32) {
    %c0_i32 = arith.constant 0 : i32
    %c0_i32_0 = arith.constant 0 : i32
    %c0_i32_1 = arith.constant 0 : i32
    return %c0_i32, %c0_i32_0 : i32, i32
  }
  func.func @transform_1(%arg0: i32, %arg1: i32) -> i32 {
    %c0_i32 = arith.constant 0 : i32
    %c0_i32_0 = arith.constant 0 : i32
    return %c0_i32 : i32
  }
  func.func @transform_2(%arg0: i32, %arg1: i32) -> (i32, i32, i32, i32) {
    %c0_i32 = arith.constant 0 : i32
    %c0_i32_0 = arith.constant 0 : i32
    %c0_i32_1 = arith.constant 0 : i32
    return %arg0, %c0_i32, %arg1, %c0_i32_0 : i32, i32, i32, i32
  }
  func.func @transform_3(%arg0: i32, %arg1: i32) -> (i32, i32, i32, i32) {
    %c0_i32 = arith.constant 0 : i32
    %c0_i32_0 = arith.constant 0 : i32
    %c0_i32_1 = arith.constant 0 : i32
    return %arg0, %c0_i32, %arg1, %c0_i32_0 : i32, i32, i32, i32
  }
}

</mosaic_0001>

<bundles_post_ra>
// kernel: tpu_custom_call.1
= control target key start
LH: loop header
LB: loop body
LE: loop exit
PB: predicated region body
PF: predicated region fallthrough
CT: control target
= control target key end

     0   :  { %8 = vsyncpa [#allocation5], 0  ;;  %s1030_s0 = inlined_call_operand.hbm [shape: f32[4,4], index: 0, kind: input, shape index: {}]   ;;  %s1031_s1 = inlined_call_operand.vmem [shape: f32[4], index: 1, kind: input, shape index: {}]   ;;  %s1032_s2 = inlined_call_operand.hbm [shape: f32[2,4,2,128], index: 2, kind: input, shape index: {}]   ;;  %s1033_s3 = inlined_call_operand.hbm [shape: f32[2,4,2,128], index: 3, kind: output, shape index: {}]  }
   0x1   :  { %9 = vsyncpa [#allocation6], 0 }
   0x2   :  { %10 = vsyncpa [#allocation3], 0 }
   0x3   :  { %12 = vsyncpa [#allocation3 + $0x1], 0 }
   0x4   :  { %13 = vsyncpa [#allocation4], 0 }
   0x5   :  { %15 = vsyncpa [#allocation4 + $0x1], 0  ;;  %s749_s12 = smov 0   ;;  %s751_s13 = smov 0  }
   0x6   :  { %s753_s14 = smov 0   ;;  %s755_s15 = smov 0  }
   0x7   :  { %s757_s16 = smov 0   ;;  %s759_s17 = smov 0  }
   0x8 LB: > { %s442_s18 = sadd.s32 4294967295, %s719_s17   ;;  %s443_s19 = sadd.s32 4294967294, %s719_s17   ;;  %s719_s17 = sphi %s759_s17, %s21_s17   ;;  %s715_s16 = sphi %s757_s16, %s1056_s16   ;;  %s711_s15 = sphi %s755_s15, %s1055_s15   ;;  %s707_s14 = sphi %s753_s14, %s1054_s14   ;;  %s703_s13 = sphi %s751_s13, %s1053_s13   ;;  %s699_s12 = sphi %s749_s12, %s1052_s12  }
   0x9   : > { %s84_s20 = sadd.s32 1, %s707_s14  ;;  %p91_p0 = scmp.ne.s32.totalorder %s707_s14, %s703_s13 }
   0xa   : > { %p92_p1 = scmp.eq.s32.totalorder %s719_s17, 0  ;;  %p97_p2 = scmp.ne.s32.totalorder %s703_s13, %s699_s12 }
   0xb   : > { %p787_p3 = scmp.eq.s32.totalorder %s442_s18, 0  ;;  %p123_p4 = scmp.eq.s32.totalorder %s442_s18, 1 }
   0xc   : > { %p93_p5 = por %p92_p1, %p91_p0  ;;  %p129_p6 = scmp.eq.s32.totalorder %s443_s19, 1 }
   0xd   : > { %s1039_s21 = scalar_select %p787_p3, 1, 0 }
   0xe   : > { %p793_p7 = por %p787_p3, %p97_p2  ;;  %p797_p8 = por %p123_p4, %p91_p0 }
   0xf   : > { %p801_p9 = por %p129_p6, %p97_p2  ;;  %p444_p10 = scmp.ge.s32.totalorder %s719_s17, 1 }
  0x10   : > { %s1040_s22 = scalar_select %p793_p7, 1, 0 }
  0x11   : > { %s1041_s23 = scalar_select %p797_p8, 1, 0 }
  0x12   : > { %s1042_s24 = scalar_select %p801_p9, 1, 0 }
  0x13   : > { %p136_p11 = scmp.lt.s32.totalorder %s719_s17, 3  ;;  %p513_p1 = scmp.lt.s32.totalorder %s719_s17, 2 }
  0x14   : > { %s158_s28 = sshll.u32 %s1031_s1, 4  ;;  %s169_s4 = sand.u32 1, %s707_s14   ;;  %s159_s28 = int_to_ptr.vmem [resolvable:$true] %s158_s28 }
  0x15   : > { %p808_p13 = pnand %p444_p10, %p136_p11  ;;  %p818_p4 = pnand %p513_p1, %p93_p5 }
  0x16   : > { %s33_s5 = sadd.s32 1, %s715_s16  ;;  %s571_s8 = scalar_lea.hbm %s1030_s0, 64 }
  0x17   : > { %p496_p0 = pneg %p808_p13  ;;  %p572_p5 = scmp.ne.s32.totalorder %s1030_s0, %s571_s8 }
  0x18   : > { %p578_p1 = scmp.lt.u32.totalorder %s571_s8, %s1030_s0 }
  0x19   : > { %p824_p2 = pnand %p496_p0, %p787_p3 }
  0x1b   : > { %p573_p6 = pneg %p824_p2 }
  0x1d   : > { %p574_p10 = pnand %p573_p6, %p572_p5 }
  0x1f   : > { %p575_p11 = pneg %p574_p10 }
  0x21   : > { %p580_p0 = pnand %p578_p1, %p575_p11 }
  0x23   : > { %583 = shalt.err (!%p580_p0)
}
  0x24   : > { %s721_s19 = smov [#allocation2]   ;;  %s584_s6 = scalar_lea.vmem %s159_s28, 16 }
  0x25   : > { %499 = dma.hbm_to_smem (!%p824_p2), %s1030_s0, 64, %s721_s19, [#allocation5]  }
  0x26   : > { %p585_p12 = scmp.ne.s32.totalorder %s159_s28, %s584_s6  ;;  %p592_p7 = scmp.lt.s32.totalorder %s159_s28, %s159_s28 }
  0x27   : > { %p593_p5 = scmp.lt.s32.totalorder %s584_s6, %s584_s6 }
  0x28   : > { %p587_p9 = pnand %p585_p12, %p573_p6 }
  0x29   : > { %p594_p10 = por %p593_p5, %p592_p7 }
  0x2a   : > { %p588_p8 = pneg %p587_p9 }
  0x2c   : > { %p595_p3 = pnand %p594_p10, %p588_p8 }
  0x2e   : > { %598 = shalt.err (!%p595_p3)
}
  0x2f   : > { %s722_s7 = smov [#allocation7]   ;;  %p35_p11 = scmp.ge.s32.totalorder %s33_s5, 2 }
  0x30   : > { %502 = dma.vmem_to_smem (!%p824_p2), %s159_s28, 16, %s722_s7, [#allocation6]  }
  0x31   : > { %s448_s8 = sshll.u32 %s169_s4, 3  ;;  %s482_s9 = sshll.u32 %s715_s16, 7 }
  0x32   : > { %s1058_s5 = smov (%p35_p11, %s33_s5), 0  ;;  %s856_s30 = scalar_lea.hbm %s1032_s2, %s482_s9 }
  0x33   : > { %s79_s18 = ssub.s32 %s715_s16, %s1058_s5  ;;  %s173_s19 = scalar_lea.vmem [#allocation8], %s448_s8 }
  0x34   : > { %s181_s28 = sshll.u32 %s173_s19, 4  ;;  %p82_p3 = scmp.eq.s32.totalorder %s79_s18, 0  ;;  %s860_s28 = int_to_ptr.vmem [resolvable:$true] %s181_s28 }
  0x35   : > { %s869_s27 = scalar_lea.sflag [#allocation3], %s169_s4  ;;  %s599_s6 = scalar_lea.hbm %s856_s30, 128 }
  0x36   : > { %s865_s26 = scalar_select %p82_p3, %s707_s14, %s84_s20  }
  0x37   : > { %p600_p7 = scmp.ne.s32.totalorder %s856_s30, %s599_s6  ;;  %p601_p8 = pneg %p818_p4 }
  0x38   : > { %s604_s9 = scalar_lea.hbm %s1032_s2, 256  ;;  %p605_p2 = scmp.lt.u32.totalorder %s856_s30, %s1032_s2 }
  0x39   : > { %p602_p9 = pnand %p601_p8, %p600_p7  ;;  %p606_p6 = scmp.lt.u32.totalorder %s604_s9, %s599_s6 }
  0x3a   : > { %p608_p0 = scmp.lt.u32.totalorder %s599_s6, %s856_s30 }
  0x3b   : > { %p603_p12 = pneg %p602_p9  ;;  %p607_p1 = por %p606_p6, %p605_p2 }
  0x3d   : > { %p609_p5 = por %p608_p0, %p607_p1 }
  0x3f   : > { %p610_p10 = pnand %p609_p5, %p603_p12 }
  0x41   : > { %613 = shalt.err (!%p610_p10)
}
  0x42   : > { %s614_s20 = scalar_lea.vmem %s860_s28, 128  ;;  %s723_s4 = smov [#allocation8]  }
  0x43   : > { %p615_p11 = scmp.ne.s32.totalorder %s860_s28, %s614_s20  ;;  %s619_s18 = sshll.u32 %s723_s4, 4  ;;  %s620_s18 = int_to_ptr.vmem [resolvable:$false] %s619_s18 }
  0x44   : > { %s621_s19 = scalar_lea.vmem %s620_s18, 256  ;;  %p622_p9 = scmp.lt.s32.totalorder %s860_s28, %s620_s18 }
  0x45   : > { %p617_p3 = pnand %p615_p11, %p601_p8  ;;  %p623_p2 = scmp.lt.s32.totalorder %s621_s19, %s614_s20 }
  0x47   : > { %p618_p7 = pneg %p617_p3  ;;  %p624_p6 = por %p623_p2, %p622_p9 }
  0x49   : > { %p625_p1 = pnand %p624_p6, %p618_p7 }
  0x4b   : > { %628 = shalt.err (!%p625_p1)
}
  0x4c   : > { %s724_s6 = smov 32   ;;  %s725_s7 = smov 2  }
  0x4d   : > { %506 = dma.hbm_to_vmem [thread:$0]  (!%p818_p4), %s856_s30, 128, %s860_s28, %s869_s27, %s724_s6, %s724_s6, %s725_s7  }
  0x4e   : > { %193 = sbr.rel (%p808_p13) target bundleno = 136 (0x88), region = 32  ;;  %p1046_p8 = scmp.ne.s32.totalorder (!%p808_p13), %s1039_s21, 0 }
  0x55   : > { %682 = dma.done.wait (%p1046_p8), [#allocation5], 64  }
  0x56   : > { %684 = vsyncadd (%p1046_p8), [#allocation5], 4294967232 }
  0x57   : > { %686 = dma.done.wait (%p1046_p8), [#allocation6], 16  }
  0x58   : > { %688 = vsyncadd (%p1046_p8), [#allocation6], 4294967280  ;;  %s908_s8 = sand.u32 1, %s703_s13   ;;  %p1047_p13 = scmp.ne.s32.totalorder %s1040_s22, 0 }
  0x59   : > { %s1038_s25 = sshll.u32 %s908_s8, 3  ;;  %s204_s29 = scalar_lea.sflag [#allocation3], %s908_s8 }
  0x5a   : > { %s914_s30 = scalar_lea.vmem [#allocation8], %s1038_s25 }
  0x5b   : > { %690 = dma.done.wait (%p1047_p13), %s204_s29, 128  }
  0x5c   : > { %692 = vsyncadd (%p1047_p13), %s204_s29, 4294967168 }
  0x5d   : > { %212 = sfence }
  0x5e   : > { %s235_s21 = sld [smem:[#allocation7]]  ;;  %s459_s11 = sld [smem:[#allocation7 + $0x1]]  ;;  %v923_v0 = vld [vmem:[%s914_s30] sm:$0x3]  ;;  %v232_v2 = vld [vmem:[%s914_s30 + $0x2] sm:$0x3] }
  0x5f   : > { %s238_s28 = sld [smem:[#allocation2]]  ;;  %s460_s20 = sld [smem:[#allocation2 + $0x1]]  ;;  %v233_v10 = vld [vmem:[%s914_s30 + $0x4] sm:$0x3]  ;;  %v234_v12 = vld [vmem:[%s914_s30 + $0x6] sm:$0x3] }
  0x60   : > { %s456_s27 = sld [smem:[#allocation2 + $0x80]]  ;;  %s925_s4 = sld [smem:[#allocation2 + $0x81]] }
  0x61   : > { %s457_s9 = sld [smem:[#allocation2 + $0x100]]  ;;  %s927_s18 = sld [smem:[#allocation2 + $0x101]] }
  0x62   : > { %s920_s10 = sld [smem:[#allocation2 + $0x180]]  ;;  %s929_s22 = sld [smem:[#allocation2 + $0x181]] }
  0x63   : > { %s931_s19 = sld [smem:[#allocation7 + $0x2]]  ;;  %s946_s25 = sld [smem:[#allocation7 + $0x3]] }
  0x64   : > { %v236_v1 = vstv %s235_s21  ;;  %s935_s6 = sld [smem:[#allocation2 + $0x2]]  ;;  %v256_v11 = vstv %s459_s11  ;;  %s1048_s30 = sshll.u32 %s908_s8, 3 }
  0x65   : > { %v237_v3 = vadd.f32 %v236_v1, %v923_v0  ;;  %v239_v4 = vstv %s238_s28  ;;  %s937_s7 = sld [smem:[#allocation2 + $0x82]]  ;;  %s948_s28 = sld [smem:[#allocation2 + $0x3]]  ;;  %v257_v15 = vadd.f32 %v256_v11, %v232_v2  ;;  %v259_v16 = vstv %s460_s20 }
  0x66   : > { %v243_v5 = vstv %s456_s27  ;;  %v240_v6 = vmul.f32 %v239_v4, %v923_v0  ;;  %s941_s29 = sld [smem:[#allocation2 + $0x102]]  ;;  %s951_s27 = sld [smem:[#allocation2 + $0x83]]  ;;  %v260_v18 = vmul.f32 %v259_v16, %v923_v0  ;;  %v263_v19 = vstv %s925_s4 }
  0x67   : > { %v244_v7 = vmul.f32 %v243_v5, %v232_v2  ;;  %v247_v8 = vstv %s457_s9  ;;  %s943_s21 = sld [smem:[#allocation2 + $0x182]]  ;;  %v267_v20 = vstv %s927_s18  ;;  %s956_s9 = sld [smem:[#allocation2 + $0x103]]  ;;  %v264_v22 = vmul.f32 %v263_v19, %v232_v2 }
  0x68   : > { %v251_v9 = vstv %s920_s10  ;;  %v241_v13 = vadd.f32 %v240_v6, %v237_v3  ;;  %v248_v14 = vmul.f32 %v247_v8, %v233_v10  ;;  %s958_s10 = sld [smem:[#allocation2 + $0x183]]  ;;  %v268_v23 = vmul.f32 %v267_v20, %v233_v10  ;;  %s230_s11 = scalar_lea.vmem [#allocation9], %s1048_s30 }
  0x69   : > { %v252_v17 = vmul.f32 %v251_v9, %v234_v12  ;;  %v271_v24 = vstv %s929_s22  ;;  %v261_v25 = vadd.f32 %v260_v18, %v257_v15  ;;  %v277_v27 = vstv %s931_s19  ;;  %s483_s20 = sshll.u32 %s711_s15, 7  ;;  %s319_s19 = scalar_lea.sflag [#allocation4], %s908_s8 }
  0x6a   : > { %v245_v21 = vadd.f32 %v244_v7, %v241_v13  ;;  %v272_v26 = vmul.f32 %v271_v24, %v234_v12  ;;  %v280_v28 = vstv %s935_s6  ;;  %v278_v30 = vadd.f32 %v277_v27, %v233_v10  ;;  %s981_s22 = scalar_lea.hbm %s1033_s3, %s483_s20  ;;  %p1049_p12 = scmp.ne.s32.totalorder %s1041_s23, 0 }
  0x6b   : > { %v281_v31 = vmul.f32 %v280_v28, %v923_v0  ;;  %v284_v32 = vstv %s937_s7  ;;  %v265_v33 = vadd.f32 %v264_v22, %v261_v25  ;;  %v298_v42 = vstv %s946_s25  ;;  %s333_s25 = sshll.u32 %s230_s11, 4  ;;  %s726_s15 = smov [#allocation9]   ;;  %s976_s25 = int_to_ptr.vmem [resolvable:$true] %s333_s25 }
  0x6c   : > { %v249_v29 = vadd.f32 %v248_v14, %v245_v21  ;;  %v285_v34 = vmul.f32 %v284_v32, %v232_v2  ;;  %v288_v35 = vstv %s941_s29  ;;  %v301_v43 = vstv %s948_s28  ;;  %s629_s6 = scalar_lea.vmem %s976_s25, 128  ;;  %s633_s7 = sshll.u32 %s726_s15, 4  ;;  %s634_s7 = int_to_ptr.vmem [resolvable:$false] %s633_s7 }
  0x6d   : > { %v292_v36 = vstv %s943_s21  ;;  %v282_v38 = vadd.f32 %v281_v31, %v278_v30  ;;  %v289_v39 = vmul.f32 %v288_v35, %v233_v10  ;;  %v269_v41 = vadd.f32 %v268_v23, %v265_v33  ;;  %p630_p4 = scmp.ne.s32.totalorder %s976_s25, %s629_s6  ;;  %s635_s29 = scalar_lea.vmem %s634_s7, 256 }
  0x6e   : > { %v253_v37 = vadd.f32 %v252_v17, %v249_v29  ;;  %v293_v40 = vmul.f32 %v292_v36, %v234_v12  ;;  %v305_v44 = vstv %s951_s27  ;;  %v299_v46 = vadd.f32 %v298_v42, %v234_v12  ;;  %p636_p10 = scmp.lt.s32.totalorder %s976_s25, %s634_s7  ;;  %p637_p11 = scmp.lt.s32.totalorder %s635_s29, %s629_s6 }
  0x6f   : > { %v286_v45 = vadd.f32 %v285_v34, %v282_v38  ;;  %v302_v47 = vmul.f32 %v301_v43, %v923_v0  ;;  %v306_v48 = vmul.f32 %v305_v44, %v232_v2  ;;  %v273_v49 = vadd.f32 %v272_v26, %v269_v41  ;;  %p631_p0 = pnand %p630_p4, %p1049_p12 }
  0x70   : > { %254 = vst [vmem:[%s230_s11] sm:$0x3] %v253_v37  ;;  %v309_v50 = vstv %s956_s9  ;;  %v313_v51 = vstv %s958_s10  ;;  %p638_p3 = por %p637_p11, %p636_p10 }
  0x71   : > { %v290_v52 = vadd.f32 %v289_v39, %v286_v45  ;;  %v303_v53 = vadd.f32 %v302_v47, %v299_v46  ;;  %v310_v54 = vmul.f32 %v309_v50, %v233_v10  ;;  %464 = vst [vmem:[%s230_s11 + $0x2] sm:$0x3] %v273_v49  ;;  %v314_v57 = vmul.f32 %v313_v51, %v234_v12  ;;  %p632_p5 = pneg %p631_p0 }
  0x73   : > { %v294_v55 = vadd.f32 %v293_v40, %v290_v52  ;;  %v307_v56 = vadd.f32 %v306_v48, %v303_v53  ;;  %p639_p7 = pnand %p638_p3, %p632_p5 }
  0x75   : > { %470 = vst [vmem:[%s230_s11 + $0x4] sm:$0x3] %v294_v55  ;;  %v311_v58 = vadd.f32 %v310_v54, %v307_v56 }
  0x77   : > { %v315_v59 = vadd.f32 %v314_v57, %v311_v58 }
  0x79   : > { %476 = vst [vmem:[%s230_s11 + $0x6] sm:$0x3] %v315_v59 }
  0x7a   : > { %642 = shalt.err (!%p639_p7)
}
  0x7b   : > { %s643_s21 = scalar_lea.hbm %s981_s22, 128  ;;  %s647_s9 = scalar_lea.hbm %s1033_s3, 256 }
  0x7c   : > { %p644_p9 = scmp.ne.s32.totalorder %s981_s22, %s643_s21  ;;  %p648_p1 = scmp.lt.u32.totalorder %s981_s22, %s1033_s3 }
  0x7d   : > { %p649_p8 = scmp.lt.u32.totalorder %s647_s9, %s643_s21  ;;  %p651_p4 = scmp.lt.u32.totalorder %s643_s21, %s981_s22 }
  0x7e   : > { %p645_p2 = pnand %p644_p9, %p1049_p12 }
  0x7f   : > { %p650_p13 = por %p649_p8, %p648_p1 }
  0x80   : > { %p646_p6 = pneg %p645_p2 }
  0x81   : > { %p652_p0 = por %p651_p4, %p650_p13 }
  0x83   : > { %p653_p5 = pnand %p652_p0, %p646_p6 }
  0x85   : > { %656 = shalt.err (!%p653_p5)
}
  0x86   : > { %s727_s11 = smov 32   ;;  %s728_s20 = smov 2  }
  0x87   : > { %494 = dma.vmem_to_hbm [thread:$0]  (%p1049_p12), %s976_s25, 128, %s981_s22, %s319_s19, %s727_s11, %s727_s11, %s728_s20  }
  0x88 PF: > { %s348_s4 = sand.u32 1, %s699_s12   ;;  %p1050_p10 = scmp.ne.s32.totalorder %s1042_s24, 0 }
  0x89   : > { %p1051_p11 = scmp.ge.s32.totalorder %s719_s17, 2  ;;  %s349_s18 = scalar_lea.sflag [#allocation4], %s348_s4 }
  0x8b   : > { %p508_p3 = pnand %p1051_p11, %p1050_p10 }
  0x8d   : > { %694 = dma.done.wait (!%p508_p3), %s349_s18, 128  }
  0x8e   : > { %696 = vsyncadd (!%p508_p3), %s349_s18, 4294967168  ;;  %s21_s17 = sadd.s32 1, %s719_s17   ;;  %s1052_s12 = smov %s703_s13 }
  0x8f   : > { %p18_p7 = scmp.ge.s32.totalorder %s21_s17, 4   ;;  %s1053_s13 = smov %s707_s14 }
  0x90   : > { %s1054_s14 = smov %s865_s26  ;;  %s1055_s15 = smov %s715_s16 }
  0x91   : > { %s1056_s16 = smov %s1058_s5  ;;  %20 = sbr.rel (!%p18_p7) target bundleno = 8 (0x8), region = 90 }
  0x98   :  { %354 = vsyncpa [#allocation3], 1 }
  0x99   :  { %356 = vsyncpa [#allocation3 + $0x1], 1 }
  0x9a   :  { %357 = vsyncpa [#allocation4], 1 }
  0x9b   :  { %359 = vsyncpa [#allocation4 + $0x1], 1 }
  0x9c   :  { %360 = vsyncpa [#allocation5], 1 }
  0x9d   :  { %362 = vsyncpa [#allocation5 + $0x1], 1 }
  0x9e   :  { %363 = vsyncpa [#allocation6], 1 }
  0x9f   :  { %365 = vsyncpa [#allocation6 + $0x1], 1 }

</bundles_post_ra>
